<compile_context>
chip_gen: v5e
topology: v5e:2x2
jax: 0.10.0
libtpu: 0.0.40
codegen_flags: <defaults>
</compile_context>

<pallas_src>
import functools

import jax
import jax.numpy as jnp
from jax.experimental import pallas as pl
from jax.experimental.pallas import tpu as pltpu


def _mlp_corrector_kernel(k_ref, w0_ref, b0_ref, w1_ref, b1_ref,
                          w2_ref, b2_ref, w3_ref, b3_ref, out_ref):
    """Forward pass for one lane-tile of rows (transposed orientation).

    k_ref : (3, TN)        wavevectors, batch on the lane axis
    wX    : (out, in)      Linear weights as stored by PyTorch (no transpose)
    bX    : (out, 1)       biases, broadcast over lanes
    out   : (1, TN)        (0.1 + mlp(k)) / (1 + |k|^2)
    """
    x = k_ref[...]                                            # (3, TN) f32

    # kk = k1^2 + k2^2 + k3^2 from three sublane rows -> per-lane VPU only.
    kk = (x[0:1, :] * x[0:1, :]
          + x[1:2, :] * x[1:2, :]
          + x[2:3, :] * x[2:3, :])                            # (1, TN)

    # fc0 -> ReLU     (h = W @ x + b, hidden on sublanes, batch on lanes)
    h = jnp.dot(w0_ref[...], x, preferred_element_type=jnp.float32) + b0_ref[...]
    h = jnp.maximum(h, 0.0)
    # fc1 -> ReLU
    h = jnp.dot(w1_ref[...], h, preferred_element_type=jnp.float32) + b1_ref[...]
    h = jnp.maximum(h, 0.0)
    # fc2 -> ReLU
    h = jnp.dot(w2_ref[...], h, preferred_element_type=jnp.float32) + b2_ref[...]
    h = jnp.maximum(h, 0.0)
    # fc3 (no activation)
    o = jnp.dot(w3_ref[...], h, preferred_element_type=jnp.float32) + b3_ref[...]  # (1, TN)

    out_ref[...] = (0.1 + o) / (1.0 + kk)


@functools.partial(jax.jit, static_argnames=("tile_n",))
def net_c3_corrector_forward(k, params, *, tile_n=8192):
    """k: (..., 3) float32.  Returns array of shape k.shape[:-1]."""
    (w0, b0), (w1, b1), (w2, b2), (w3, b3) = params
    hidden = w0.shape[0]

    batch_shape = k.shape[:-1]
    n = 1
    for d in batch_shape:
        n *= d
    n = max(n, 1)

    # Effective tile: large enough to amortize the ~600-cycle per-step pipeline
    # overhead, but never bigger than the (128-rounded) row count, so small
    # inputs don't get padded out to 8192 lanes.
    tile = min(tile_n, pl.cdiv(n, 128) * 128)
    n_pad = pl.cdiv(n, tile) * tile
    num_tiles = n_pad // tile

    # Flatten rows, move batch to the lane axis, pad lanes to the tile multiple
    # with jnp.pad (fuses under jit; no zeros+scatter second HBM pass).
    k2d = k.reshape(n, 3).astype(jnp.float32)
    kT = jnp.pad(k2d.T, ((0, 0), (0, n_pad - n)))

    # Weights stay (out, in); biases become (out, 1) column vectors.
    w0f, w1f, w2f, w3f = (w.astype(jnp.float32) for w in (w0, w1, w2, w3))
    b0c, b1c, b2c, b3c = (b.astype(jnp.float32)[:, None] for b in (b0, b1, b2, b3))

    const = lambda shape: pl.BlockSpec(shape, lambda i: (0, 0))

    # Honest cost estimate: k and out tiles move as 8-sublane-padded f32 slabs;
    # weights/biases are DMA'd once.
    flops_per_row = 2 * (3 * hidden + hidden * hidden + hidden * hidden + hidden) + 8
    param_bytes = 4 * sum(int(a.size) for a in
                          (w0f, b0c, w1f, b1c, w2f, b2c, w3f, b3c))
    cost = pl.CostEstimate(
        flops=flops_per_row * n_pad,
        transcendentals=0,
        bytes_accessed=4 * 8 * n_pad + 4 * 8 * n_pad + param_bytes,
    )

    out = pl.pallas_call(
        _mlp_corrector_kernel,
        out_shape=jax.ShapeDtypeStruct((1, n_pad), jnp.float32),
        grid=(num_tiles,),
        in_specs=[
            pl.BlockSpec((3, tile), lambda i: (0, i)),         # k tile (pipelined)
            const(w0f.shape), const(b0c.shape),                # VMEM-resident params
            const(w1f.shape), const(b1c.shape),
            const(w2f.shape), const(b2c.shape),
            const(w3f.shape), const(b3c.shape),
        ],
        out_specs=pl.BlockSpec((1, tile), lambda i: (0, i)),   # lane-dense output
        compiler_params=pltpu.CompilerParams(
            dimension_semantics=("parallel",),
            # Explicit cap: safe on all generations (<= 64 MiB v7x physical),
            # and lifts v5e's 16 MiB scoped default if tile_n is swept higher.
            vmem_limit_bytes=32 * 1024 * 1024,
        ),
        cost_estimate=cost,
    )(kT, w0f, b0c, w1f, b1c, w2f, b2c, w3f, b3c)

    return out[0, :n].reshape(batch_shape)


def init_params(key, hidden):
    """Deterministic PyTorch-Linear-style init: U(-1/sqrt(fan_in), 1/sqrt(fan_in))."""
    def linear(key, fan_in, fan_out):
        kw, kb = jax.random.split(key)
        bound = 1.0 / jnp.sqrt(jnp.float32(fan_in))
        w = jax.random.uniform(kw, (fan_out, fan_in), jnp.float32, -bound, bound)
        b = jax.random.uniform(kb, (fan_out,), jnp.float32, -bound, bound)
        return w, b

    k0, k1, k2, k3 = jax.random.split(key, 4)
    return (
        linear(k0, 3, hidden),
        linear(k1, hidden, hidden),
        linear(k2, hidden, hidden),
        linear(k3, hidden, 1),
    )


def reference_forward(k, params):
    """Pure-JAX reference mirroring the PyTorch forward exactly."""
    (w0, b0), (w1, b1), (w2, b2), (w3, b3) = params
    kk = jnp.sum(k * k, axis=-1)
    out = jnp.maximum(k @ w0.T + b0, 0.0)
    out = jnp.maximum(out @ w1.T + b1, 0.0)
    out = jnp.maximum(out @ w2.T + b2, 0.0)
    out = out @ w3.T + b3
    return (0.1 + out.squeeze(-1)) / (1.0 + kk)


if __name__ == "__main__":
    key = jax.random.PRNGKey(0)
    k_in_key, p_key = jax.random.split(key)

    hidden = 32
    batch, seq = 2, 8                       # k: (2, 8, 3) wavevectors
    k = jax.random.normal(k_in_key, (batch, seq, 3), jnp.float32)

    params = init_params(p_key, hidden)

    out = net_c3_corrector_forward(k, params)
    out = jax.block_until_ready(out)

    ref = reference_forward(k, params)
    assert out.shape == ref.shape == (batch, seq)
    assert jnp.allclose(out, ref, atol=1e-5, rtol=1e-5)

    print("KERNEL_OK")
</pallas_src>

<mosaic_0001>
module attributes {stable_mosaic.version = 11 : i64} {
  func.func @_mlp_corrector_kernel(%arg0: i32, %arg1: memref<3x128xf32, #tpu.memory_space<vmem>>, %arg2: memref<32x3xf32, #tpu.memory_space<vmem>>, %arg3: memref<32x1xf32, #tpu.memory_space<vmem>>, %arg4: memref<32x32xf32, #tpu.memory_space<vmem>>, %arg5: memref<32x1xf32, #tpu.memory_space<vmem>>, %arg6: memref<32x32xf32, #tpu.memory_space<vmem>>, %arg7: memref<32x1xf32, #tpu.memory_space<vmem>>, %arg8: memref<1x32xf32, #tpu.memory_space<vmem>>, %arg9: memref<1x1xf32, #tpu.memory_space<vmem>>, %arg10: memref<1x128xf32, #tpu.memory_space<vmem>>) attributes {dimension_semantics = [#tpu.dimension_semantics<parallel>], iteration_bounds = array<i64: 1>, scalar_prefetch = 0 : i64, scratch_operands = 0 : i64, tpu.core_type = #tpu.core_type<tc>, window_params = [{transform_indices = @transform_0, window_bounds = array<i64: 3, 128>}, {pipeline_mode = #tpu.pipeline_mode<synchronous>, transform_indices = @transform_1, window_bounds = array<i64: 32, 3>}, {pipeline_mode = #tpu.pipeline_mode<synchronous>, transform_indices = @transform_2, window_bounds = array<i64: 32, 1>}, {pipeline_mode = #tpu.pipeline_mode<synchronous>, transform_indices = @transform_3, window_bounds = array<i64: 32, 32>}, {pipeline_mode = #tpu.pipeline_mode<synchronous>, transform_indices = @transform_4, window_bounds = array<i64: 32, 1>}, {pipeline_mode = #tpu.pipeline_mode<synchronous>, transform_indices = @transform_5, window_bounds = array<i64: 32, 32>}, {pipeline_mode = #tpu.pipeline_mode<synchronous>, transform_indices = @transform_6, window_bounds = array<i64: 32, 1>}, {pipeline_mode = #tpu.pipeline_mode<synchronous>, transform_indices = @transform_7, window_bounds = array<i64: 1, 32>}, {pipeline_mode = #tpu.pipeline_mode<synchronous>, transform_indices = @transform_8, window_bounds = array<i64: 1, 1>}, {transform_indices = @transform_9, window_bounds = array<i64: 1, 128>}]} {
    %c0 = arith.constant 0 : index
    %c0_0 = arith.constant 0 : index
    %0 = vector.load %arg1[%c0, %c0_0] : memref<3x128xf32, #tpu.memory_space<vmem>>, vector<3x128xf32>
    %1 = vector.extract_strided_slice %0 {offsets = [0, 0], sizes = [1, 128], strides = [1, 1]} : vector<3x128xf32> to vector<1x128xf32>
    %2 = vector.extract_strided_slice %0 {offsets = [0, 0], sizes = [1, 128], strides = [1, 1]} : vector<3x128xf32> to vector<1x128xf32>
    %3 = arith.mulf %1, %2 : vector<1x128xf32>
    %4 = vector.extract_strided_slice %0 {offsets = [1, 0], sizes = [1, 128], strides = [1, 1]} : vector<3x128xf32> to vector<1x128xf32>
    %5 = vector.extract_strided_slice %0 {offsets = [1, 0], sizes = [1, 128], strides = [1, 1]} : vector<3x128xf32> to vector<1x128xf32>
    %6 = arith.mulf %4, %5 : vector<1x128xf32>
    %7 = arith.addf %3, %6 : vector<1x128xf32>
    %8 = vector.extract_strided_slice %0 {offsets = [2, 0], sizes = [1, 128], strides = [1, 1]} : vector<3x128xf32> to vector<1x128xf32>
    %9 = vector.extract_strided_slice %0 {offsets = [2, 0], sizes = [1, 128], strides = [1, 1]} : vector<3x128xf32> to vector<1x128xf32>
    %10 = arith.mulf %8, %9 : vector<1x128xf32>
    %11 = arith.addf %7, %10 : vector<1x128xf32>
    %c0_1 = arith.constant 0 : index
    %c0_2 = arith.constant 0 : index
    %12 = vector.load %arg2[%c0_1, %c0_2] : memref<32x3xf32, #tpu.memory_space<vmem>>, vector<32x3xf32>
    %cst = arith.constant dense<0.000000e+00> : vector<32x128xf32>
    %13 = tpu.matmul %12, %0, %cst {dimension_numbers = #tpu.dot_dimension_numbers<[1], [0], [0], [1], [0, 0, 1, 1], [], []>} : vector<32x3xf32>, vector<3x128xf32>, vector<32x128xf32> -> vector<32x128xf32>
    %c0_3 = arith.constant 0 : index
    %c0_4 = arith.constant 0 : index
    %14 = vector.load %arg3[%c0_3, %c0_4] : memref<32x1xf32, #tpu.memory_space<vmem>>, vector<32x1xf32>
    %15 = vector.broadcast %14 : vector<32x1xf32> to vector<32x128xf32>
    %16 = arith.addf %13, %15 : vector<32x128xf32>
    %cst_5 = arith.constant 0.000000e+00 : f32
    %17 = vector.broadcast %cst_5 : f32 to vector<32x128xf32>
    %18 = arith.maximumf %16, %17 : vector<32x128xf32>
    %c0_6 = arith.constant 0 : index
    %c0_7 = arith.constant 0 : index
    %19 = vector.load %arg4[%c0_6, %c0_7] : memref<32x32xf32, #tpu.memory_space<vmem>>, vector<32x32xf32>
    %cst_8 = arith.constant dense<0.000000e+00> : vector<32x128xf32>
    %20 = tpu.matmul %19, %18, %cst_8 {dimension_numbers = #tpu.dot_dimension_numbers<[1], [0], [0], [1], [0, 0, 1, 1], [], []>} : vector<32x32xf32>, vector<32x128xf32>, vector<32x128xf32> -> vector<32x128xf32>
    %c0_9 = arith.constant 0 : index
    %c0_10 = arith.constant 0 : index
    %21 = vector.load %arg5[%c0_9, %c0_10] : memref<32x1xf32, #tpu.memory_space<vmem>>, vector<32x1xf32>
    %22 = vector.broadcast %21 : vector<32x1xf32> to vector<32x128xf32>
    %23 = arith.addf %20, %22 : vector<32x128xf32>
    %cst_11 = arith.constant 0.000000e+00 : f32
    %24 = vector.broadcast %cst_11 : f32 to vector<32x128xf32>
    %25 = arith.maximumf %23, %24 : vector<32x128xf32>
    %c0_12 = arith.constant 0 : index
    %c0_13 = arith.constant 0 : index
    %26 = vector.load %arg6[%c0_12, %c0_13] : memref<32x32xf32, #tpu.memory_space<vmem>>, vector<32x32xf32>
    %cst_14 = arith.constant dense<0.000000e+00> : vector<32x128xf32>
    %27 = tpu.matmul %26, %25, %cst_14 {dimension_numbers = #tpu.dot_dimension_numbers<[1], [0], [0], [1], [0, 0, 1, 1], [], []>} : vector<32x32xf32>, vector<32x128xf32>, vector<32x128xf32> -> vector<32x128xf32>
    %c0_15 = arith.constant 0 : index
    %c0_16 = arith.constant 0 : index
    %28 = vector.load %arg7[%c0_15, %c0_16] : memref<32x1xf32, #tpu.memory_space<vmem>>, vector<32x1xf32>
    %29 = vector.broadcast %28 : vector<32x1xf32> to vector<32x128xf32>
    %30 = arith.addf %27, %29 : vector<32x128xf32>
    %cst_17 = arith.constant 0.000000e+00 : f32
    %31 = vector.broadcast %cst_17 : f32 to vector<32x128xf32>
    %32 = arith.maximumf %30, %31 : vector<32x128xf32>
    %c0_18 = arith.constant 0 : index
    %c0_19 = arith.constant 0 : index
    %33 = vector.load %arg8[%c0_18, %c0_19] : memref<1x32xf32, #tpu.memory_space<vmem>>, vector<1x32xf32>
    %cst_20 = arith.constant dense<0.000000e+00> : vector<1x128xf32>
    %34 = tpu.matmul %33, %32, %cst_20 {dimension_numbers = #tpu.dot_dimension_numbers<[1], [0], [0], [1], [0, 0, 1, 1], [], []>} : vector<1x32xf32>, vector<32x128xf32>, vector<1x128xf32> -> vector<1x128xf32>
    %c0_21 = arith.constant 0 : index
    %c0_22 = arith.constant 0 : index
    %35 = vector.load %arg9[%c0_21, %c0_22] : memref<1x1xf32, #tpu.memory_space<vmem>>, vector<1x1xf32>
    %36 = vector.broadcast %35 : vector<1x1xf32> to vector<1x128xf32>
    %37 = arith.addf %34, %36 : vector<1x128xf32>
    %cst_23 = arith.constant 1.000000e-01 : f32
    %38 = vector.broadcast %cst_23 : f32 to vector<1x128xf32>
    %39 = arith.addf %38, %37 : vector<1x128xf32>
    %cst_24 = arith.constant 1.000000e+00 : f32
    %40 = vector.broadcast %cst_24 : f32 to vector<1x128xf32>
    %41 = arith.addf %40, %11 : vector<1x128xf32>
    %42 = arith.divf %39, %41 : vector<1x128xf32>
    %c0_25 = arith.constant 0 : index
    %c0_26 = arith.constant 0 : index
    %43 = vector.load %arg10[%c0_25, %c0_26] : memref<1x128xf32, #tpu.memory_space<vmem>>, vector<1x128xf32>
    tpu.vector_store %arg10[%c0_25, %c0_26], %42 {strides = array<i32>} : memref<1x128xf32, #tpu.memory_space<vmem>>, vector<1x128xf32>,
    return
  }
  func.func @transform_0(%arg0: i32) -> (i32, i32) {
    %c0_i32 = arith.constant 0 : i32
    %c0_i32_0 = arith.constant 0 : i32
    return %c0_i32, %arg0 : i32, i32
  }
  func.func @transform_1(%arg0: i32) -> (i32, i32) {
    %c0_i32 = arith.constant 0 : i32
    %c0_i32_0 = arith.constant 0 : i32
    %c0_i32_1 = arith.constant 0 : i32
    return %c0_i32, %c0_i32_0 : i32, i32
  }
  func.func @transform_2(%arg0: i32) -> (i32, i32) {
    %c0_i32 = arith.constant 0 : i32
    %c0_i32_0 = arith.constant 0 : i32
    %c0_i32_1 = arith.constant 0 : i32
    return %c0_i32, %c0_i32_0 : i32, i32
  }
  func.func @transform_3(%arg0: i32) -> (i32, i32) {
    %c0_i32 = arith.constant 0 : i32
    %c0_i32_0 = arith.constant 0 : i32
    %c0_i32_1 = arith.constant 0 : i32
    return %c0_i32, %c0_i32_0 : i32, i32
  }
  func.func @transform_4(%arg0: i32) -> (i32, i32) {
    %c0_i32 = arith.constant 0 : i32
    %c0_i32_0 = arith.constant 0 : i32
    %c0_i32_1 = arith.constant 0 : i32
    return %c0_i32, %c0_i32_0 : i32, i32
  }
  func.func @transform_5(%arg0: i32) -> (i32, i32) {
    %c0_i32 = arith.constant 0 : i32
    %c0_i32_0 = arith.constant 0 : i32
    %c0_i32_1 = arith.constant 0 : i32
    return %c0_i32, %c0_i32_0 : i32, i32
  }
  func.func @transform_6(%arg0: i32) -> (i32, i32) {
    %c0_i32 = arith.constant 0 : i32
    %c0_i32_0 = arith.constant 0 : i32
    %c0_i32_1 = arith.constant 0 : i32
    return %c0_i32, %c0_i32_0 : i32, i32
  }
  func.func @transform_7(%arg0: i32) -> (i32, i32) {
    %c0_i32 = arith.constant 0 : i32
    %c0_i32_0 = arith.constant 0 : i32
    %c0_i32_1 = arith.constant 0 : i32
    return %c0_i32, %c0_i32_0 : i32, i32
  }
  func.func @transform_8(%arg0: i32) -> (i32, i32) {
    %c0_i32 = arith.constant 0 : i32
    %c0_i32_0 = arith.constant 0 : i32
    %c0_i32_1 = arith.constant 0 : i32
    return %c0_i32, %c0_i32_0 : i32, i32
  }
  func.func @transform_9(%arg0: i32) -> (i32, i32) {
    %c0_i32 = arith.constant 0 : i32
    %c0_i32_0 = arith.constant 0 : i32
    return %c0_i32, %arg0 : i32, i32
  }
}

</mosaic_0001>

<bundles_post_ra>
// kernel: squeeze.1
= control target key start
LH: loop header
LB: loop body
LE: loop exit
PB: predicated region body
PF: predicated region fallthrough
CT: control target
= control target key end

     0   :  { %s80_s0 = inlined_call_operand.vmem [shape: f32[16], index: 0, kind: input, shape index: {}]   ;;  %s81_s1 = inlined_call_operand.hbm [shape: f32[2,8], index: 1, kind: output, shape index: {}]  }
   0x1   :  { %v5_v0 = vld [vmem:[%s80_s0] sm:$0x1] }
   0x2   :  { %2 = vsyncpa [#allocation1], 0  ;;  %6 = vst [vmem:[#allocation3] sm:$0x1] %v5_v0  ;;  %vm8_vm0 = vcmask 64512   ;;  %s62_s0 = smov 120  }
   0x3   :  { %s63_s8 = smov [#allocation0]   ;;  %s27_s1 = sshll.u32 %s81_s1, 4  ;;  %s28_s1 = int_to_ptr.hbm [resolvable:$true] %s27_s1 }
   0x4   :  { %s25_s9 = sshll.u32 %s63_s8, 4  ;;  %s26_s9 = int_to_ptr.vmem [resolvable:$true] %s25_s9 }
   0x9   :  { %v10_v1 = vld [vmem:[#allocation3] sm:$0x1]  }
   0xa   :  { %v7_v2 = vld [vmem:[#allocation3] sm:$0x1]   ;;  %11 = vrot.lane.b32.xlu0 %v10_v1, %s62_s0 }
   0xb   :  { %9 = vst.msk [vmem:[#allocation2] sm:$0x1] %vm8_vm0, %v7_v2  }
  0x7c   :  { %v12_v3 = vpop.permute.xlu0 %11  }
  0x7d   :  { %15 = vst.msk [vmem:[#allocation2 + $0x1] sm:$0x1] %vm8_vm0, %v12_v3  }
  0x84   :  { %v18_v4 = vld [vmem:[#allocation2] sm:$0x3] }
  0x85   :  { %21 = vst [vmem:[#allocation0] sm:$0x3] %v18_v4 }
  0x86   :  { %30 = dma.vmem_to_hbm [thread:$0]  %s26_s9, 32, %s28_s1, [#allocation1]  }
  0x87   :  { %60 = dma.done.wait [#allocation1], 32  }
  0x88   :  { %61 = vsyncadd [#allocation1], 4294967264 }
  0x89   :  { %33 = vsyncpa [#allocation1], 1 }

// kernel: net_c3_corrector_forward.1
= control target key start
LH: loop header
LB: loop body
LE: loop exit
PB: predicated region body
PF: predicated region fallthrough
CT: control target
= control target key end

     0   :  { %vm84_vm0 = vcmask 1042432   ;;  %vm71_vm1 = vcmask 23552   ;;  %v349_v0 = vmov 0   ;;  %vm149_vm2 = vcmask 261120   ;;  %s502_s2 = inlined_call_operand.vmem [shape: f32[32,1], index: 2, kind: input, shape index: {}]   ;;  %s503_s0 = inlined_call_operand.vmem [shape: f32[3,128], index: 0, kind: input, shape index: {}]   ;;  %s504_s1 = inlined_call_operand.vmem [shape: f32[32,3], index: 1, kind: input, shape index: {}]   ;;  %s505_s8 = inlined_call_operand.<no memory space> [shape: f32[1,1], index: 8, kind: input, shape index: {}]   ;;  %s506_s4 = inlined_call_operand.vmem [shape: f32[32,1], index: 4, kind: input, shape index: {}]   ;;  %s507_s6 = inlined_call_operand.vmem [shape: f32[32,1], index: 6, kind: input, shape index: {}]   ;;  %s508_s3 = inlined_call_operand.vmem [shape: f32[32,32], index: 3, kind: input, shape index: {}]   ;;  %s509_s5 = inlined_call_operand.vmem [shape: f32[32,32], index: 5, kind: input, shape index: {}]   ;;  %s510_s7 = inlined_call_operand.vmem [shape: f32[1,32], index: 7, kind: input, shape index: {}]   ;;  %s511_s9 = inlined_call_operand.vmem [shape: f32[1,128], index: 9, kind: output, shape index: {}]  }
   0x1   :  { %344 = vset.pattern.permute.xlu0 %v349_v0  ;;  %v50_v1 = vld [vmem:[%s502_s2 + $0x18] sm:$0xff]  ;;  %v406_v2 = vld [vmem:[%s503_s0] sm:$0x7]  ;;  %345 = vset.pattern.permute.xlu1 %v349_v0  ;;  %v14_v4 = vstv %s505_s8  ;;  %v48_v5 = vld [vmem:[%s502_s2 + $0x8] sm:$0xff] }
   0x2   :  { %v43_v3 = vld [vmem:[%s504_s1] sm:$0xff]  ;;  %68 = vperm.xlu0 %344, %v50_v1   ;;  %321 = vmatpush.msk.msra.mxu0 %vm84_vm0, %v406_v2  ;;  %15 = vst [vmem:[#allocation2] sm:$0x1] %v14_v4  ;;  %v49_v6 = vld [vmem:[%s502_s2 + $0x10] sm:$0xff]  ;;  %v44_v7 = vld [vmem:[%s504_s1 + $0x8] sm:$0xff] }
   0x3   :  { %322 = vmatmul.msk.f32.vlgmr.msra.gmra.mxu0 %vm71_vm1, %v43_v3  ;;  %58 = vperm.xlu1 %345, %v48_v5   ;;  %v47_v8 = vld [vmem:[%s502_s2] sm:$0xff]  ;;  %v126_v9 = vld [vmem:[%s506_s4 + $0x8] sm:$0xff]  ;;  %v45_v10 = vld [vmem:[%s504_s1 + $0x10] sm:$0xff] }
   0x4   :  { %346 = vset.pattern.permute.xlu2 %v349_v0  ;;  %v125_v11 = vld [vmem:[%s506_s4] sm:$0xff]  ;;  %v201_v12 = vld [vmem:[%s507_s6 + $0x10] sm:$0xff]  ;;  %v46_v13 = vld [vmem:[%s504_s1 + $0x18] sm:$0xff] }
   0x5   :  { %v200_v14 = vld [vmem:[%s507_s6 + $0x8] sm:$0xff]  ;;  %v128_v21 = vld [vmem:[%s506_s4 + $0x18] sm:$0xff]  ;;  %v127_v29 = vld [vmem:[%s506_s4 + $0x10] sm:$0xff] }
   0x6   :  { %146 = vperm.xlu2 %346, %v128_v21   ;;  %v121_v34 = vld [vmem:[%s508_s3] sm:$0xff]  ;;  %v124_v35 = vld [vmem:[%s508_s3 + $0x18] sm:$0xff]  ;;  %v122_v37 = vld [vmem:[%s508_s3 + $0x8] sm:$0xff] }
   0x7   :  { %v202_v36 = vld [vmem:[%s507_s6 + $0x18] sm:$0xff]  ;;  %v199_v38 = vld [vmem:[%s507_s6] sm:$0xff]  ;;  %v123_v39 = vld [vmem:[%s508_s3 + $0x10] sm:$0xff] }
   0x8   :  { %v195_v56 = vld [vmem:[%s509_s5] sm:$0xff]  ;;  %v198_v57 = vld [vmem:[%s509_s5 + $0x18] sm:$0xff]  ;;  %v196_v58 = vld [vmem:[%s509_s5 + $0x8] sm:$0xff] }
   0x9   :  { %v269_v15 = vld [vmem:[#allocation2] sm:$0x1]  ;;  %v197_v59 = vld [vmem:[%s509_s5 + $0x10] sm:$0xff] }
   0xa   :  { %63 = vperm.xlu0 %344, %v49_v6  }
   0xb   :  { %323 = vmatmul.msk.f32.gmra.mxu0 %vm71_vm1, %v44_v7  ;;  %53 = vperm.xlu1 %345, %v47_v8  }
   0xe   :  { %141 = vperm.xlu2 %346, %v127_v29  }
  0x12   :  { %136 = vperm.xlu0 %344, %v126_v9  }
  0x13   :  { %324 = vmatmul.msk.f32.gmra.mxu0 %vm71_vm1, %v45_v10  ;;  %131 = vperm.xlu1 %345, %v125_v11  }
  0x16   :  { %220 = vperm.xlu2 %346, %v202_v36  }
  0x1a   :  { %215 = vperm.xlu0 %344, %v201_v12  }
  0x1b   :  { %325 = vmatmul.msk.f32.gmra.mxu0 %vm71_vm1, %v46_v13  ;;  %210 = vperm.xlu1 %345, %v200_v14   ;;  %v268_v13 = vld [vmem:[%s510_s7] sm:$0x1]  ;;  %v35_v14 = vmul.f32 %v406_v2, %v406_v2 }
  0x1e   :  { %205 = vperm.xlu2 %346, %v199_v38  }
  0x22   :  { %272 = vperm.xlu0 %344, %v269_v15   ;;  %v37_v15 = vrot.slane %v35_v14, 1 }
  0x60   :  { %v147_v41 = vpop.permute.xlu2 %146 }
  0x68   :  { %v142_v47 = vpop.permute.xlu2 %141 }
  0x70   :  { %v221_v60 = vpop.permute.xlu2 %220 }
  0x74   :  { %v69_v18 = vpop.permute.xlu0 %68 }
  0x75   :  { %v59_v19 = vpop.permute.xlu1 %58 }
  0x78   :  { %v206_v8 = vpop.permute.xlu2 %205 }
  0x7c   :  { %v64_v22 = vpop.permute.xlu0 %63 }
  0x7d   :  { %v54_v26 = vpop.permute.xlu1 %53 }
  0x80   :  { %v105_v16 = vpop.f32.mrf.mxu0 }
  0x81   :  { %v106_v30 = vadd.f32 %v105_v16, %v54_v26  ;;  %v39_v16 = vadd.f32 %v37_v15, %v35_v14 }
  0x83   :  { %v117_v33 = vmax.f32 %v106_v30, 0.0 }
  0x84   :  { %v137_v46 = vpop.permute.xlu0 %136 }
  0x85   :  { %v132_v51 = vpop.permute.xlu1 %131 }
  0x88   :  { %v108_v17 = vpop.f32.mrf.mxu0 }
  0x89   :  { %v109_v27 = vadd.f32 %v108_v17, %v59_v19  ;;  %v40_v17 = vrot.slane %v35_v14, 2 }
  0x8b   :  { %v118_v32 = vmax.f32 %v109_v27, 0.0 }
  0x8c   :  { %v216_v3 = vpop.permute.xlu0 %215 }
  0x8d   :  { %v211_v4 = vpop.permute.xlu1 %210 }
  0x90   :  { %v111_v20 = vpop.f32.mrf.mxu0 }
  0x91   :  { %v112_v24 = vadd.f32 %v111_v20, %v64_v22 }
  0x93   :  { %v119_v31 = vmax.f32 %v112_v24, 0.0 }
  0x94   :  { %v273_v27 = vpop.permute.xlu0 %272 }
  0x95   :  { %v275_v29 = vperm.slane %v273_v27, 0 }
  0x98   :  { %v114_v23 = vpop.f32.mrf.mxu0 }
  0x99   :  { %v115_v25 = vadd.f32 %v114_v23, %v69_v18  ;;  %v42_v18 = vadd.f32 %v40_v17, %v39_v16 }
  0x9b   :  { %v120_v28 = vmax.f32 %v115_v25, 0.0  ;;  %v300_v19 = vadd.f32 1.0, %v42_v18 }
  0x9d   :  { %174 = vmatpush.msra.mxu1 %v120_v28  ;;  %335 = vmatpush.msra.mxu3 %v120_v28  ;;  %347 = vrcp.f32 %v300_v19  ;;  %vm306_vm3 = vweird.f32 %v300_v19  ;;  %v312_v24 = vand.u32 2147483648, %v300_v19  ;;  %v310_v26 = vand.u32 2147483647, %v300_v19 }
  0x9f   :  { %175 = vmatpush.msra.mxu1 %v119_v31  ;;  %336 = vmatpush.msra.mxu3 %v119_v31  ;;  %v313_v28 = vor.u32 1.1754944e-38, %v312_v24  ;;  %vm311_vm6 = vcmp.eq.f32.partialorder %v310_v26, 8.507059e+37 }
  0xa1   :  { %176 = vmatpush.msra.mxu1 %v118_v32  ;;  %337 = vmatpush.msra.mxu3 %v118_v32 }
  0xa3   :  { %177 = vmatpush.msra.mxu1 %v117_v33  ;;  %338 = vmatpush.msra.mxu3 %v117_v33  ;;  %v348_v20 = vpop.eup %347 }
  0xa4   :  { %326 = vmatmul.msk.f32.vlgmr.msra.gmra.mxu1 %vm149_vm2, %v121_v34  ;;  %329 = vmatmul.msk.f32.vlgmr.msra.gmra.mxu3 %vm149_vm2, %v124_v35  ;;  %v302_v21 = vmul.f32 %v348_v20, %v300_v19  ;;  %vm307_vm4 = vweird.f32 %v348_v20 }
  0xa5   :  { %vm308_vm5 = vmor %vm306_vm3, %vm307_vm4 }
  0xa6   :  { %v303_v22 = vsub.f32 1.0, %v302_v21 }
  0xa8   :  { %v304_v23 = vmul.f32 %v348_v20, %v303_v22 }
  0xaa   :  { %v305_v25 = vadd.f32 %v348_v20, %v304_v23 }
  0xac   :  { %327 = vmatmul.msk.f32.gmra.mxu1 %vm149_vm2, %v122_v37  ;;  %v309_v2 = vsel %vm308_vm5, %v348_v20, %v305_v25 }
  0xad   :  { %v314_v32 = vsel %vm311_vm6, %v313_v28, %v309_v2 }
  0xb4   :  { %328 = vmatmul.msk.f32.gmra.mxu1 %vm149_vm2, %v123_v39 }
 0x121   :  { %v179_v40 = vpop.f32.mrf.mxu1 }
 0x122   :  { %v180_v52 = vadd.f32 %v179_v40, %v132_v51 }
 0x124   :  { %v191_v55 = vmax.f32 %v180_v52, 0.0 }
 0x127   :  { %v188_v42 = vpop.f32.mrf.mxu3 }
 0x128   :  { %v189_v43 = vadd.f32 %v188_v42, %v147_v41 }
 0x129   :  { %v182_v44 = vpop.f32.mrf.mxu1 }
 0x12a   :  { %v194_v45 = vmax.f32 %v189_v43, 0.0  ;;  %v183_v49 = vadd.f32 %v182_v44, %v137_v46 }
 0x12c   :  { %247 = vmatpush.msra.mxu2 %v194_v45  ;;  %339 = vmatpush.msrb.mxu3 %v194_v45  ;;  %v192_v54 = vmax.f32 %v183_v49, 0.0 }
 0x131   :  { %v185_v48 = vpop.f32.mrf.mxu1 }
 0x132   :  { %v186_v50 = vadd.f32 %v185_v48, %v142_v47 }
 0x134   :  { %v193_v53 = vmax.f32 %v186_v50, 0.0 }
 0x136   :  { %248 = vmatpush.msra.mxu2 %v193_v53  ;;  %340 = vmatpush.msrb.mxu3 %v193_v53 }
 0x138   :  { %249 = vmatpush.msra.mxu2 %v192_v54  ;;  %341 = vmatpush.msrb.mxu3 %v192_v54 }
 0x13a   :  { %250 = vmatpush.msra.mxu2 %v191_v55  ;;  %342 = vmatpush.msrb.mxu3 %v191_v55 }
 0x13b   :  { %330 = vmatmul.msk.f32.vlgmr.msra.gmra.mxu2 %vm149_vm2, %v195_v56  ;;  %333 = vmatmul.msk.f32.vlgmr.msrb.gmra.mxu3 %vm149_vm2, %v198_v57 }
 0x143   :  { %331 = vmatmul.msk.f32.gmra.mxu2 %vm149_vm2, %v196_v58 }
 0x14b   :  { %332 = vmatmul.msk.f32.gmra.mxu2 %vm149_vm2, %v197_v59 }
 0x1be   :  { %v252_v61 = vpop.f32.mrf.mxu2  ;;  %v261_v62 = vpop.f32.mrf.mxu3 }
 0x1bf   :  { %v262_v63 = vadd.f32 %v261_v62, %v221_v60  ;;  %v253_v9 = vadd.f32 %v252_v61, %v206_v8 }
 0x1c1   :  { %v267_v0 = vmax.f32 %v262_v63, 0.0  ;;  %v264_v12 = vmax.f32 %v253_v9, 0.0 }
 0x1c3   :  { %291 = vmatpush.msra.mxu3 %v267_v0 }
 0x1c6   :  { %v255_v1 = vpop.f32.mrf.mxu2 }
 0x1c7   :  { %v256_v6 = vadd.f32 %v255_v1, %v211_v4 }
 0x1c9   :  { %v265_v11 = vmax.f32 %v256_v6, 0.0 }
 0x1ce   :  { %v258_v5 = vpop.f32.mrf.mxu2 }
 0x1cf   :  { %v259_v7 = vadd.f32 %v258_v5, %v216_v3 }
 0x1d1   :  { %v266_v10 = vmax.f32 %v259_v7, 0.0 }
 0x1d3   :  { %292 = vmatpush.msra.mxu3 %v266_v10 }
 0x1d5   :  { %293 = vmatpush.msra.mxu3 %v265_v11 }
 0x1d7   :  { %294 = vmatpush.msra.mxu3 %v264_v12 }
 0x1d8   :  { %334 = vmatmul.msk.f32.vlgmr.msra.gmra.mxu3 %vm149_vm2, %v268_v13 }
 0x25b   :  { %v296_v30 = vpop.f32.mrf.mxu3 }
 0x25c   :  { %v297_v31 = vadd.f32 %v296_v30, %v275_v29 }
 0x25e   :  { %v299_v33 = vadd.f32 0.1, %v297_v31 }
 0x260   :  { %v315_v34 = vmul.f32 %v314_v32, %v299_v33 }
 0x262   :  { %316 = vst [vmem:[%s511_s9] sm:$0x1] %v315_v34 }

</bundles_post_ra>
